<compile_context>
chip_gen: v5e
topology: v5e:2x2
jax: 0.10.0
libtpu: 0.0.40
codegen_flags: <defaults>
</compile_context>

<pallas_src>
import jax
import jax.numpy as jnp
from jax.experimental import pallas as pl
from jax.experimental.pallas import tpu as pltpu

_LANE = 128
_SUBLANE = 8


def _swish_kernel(x_ref, o_ref):
    x = x_ref[...]
    # Compute in f32 for accuracy (and because v5e has no bf16 VPU/EUP).
    xf = x.astype(jnp.float32)
    # sigmoid = 1 / (1 + exp(-x)): exp on EUP; exact reciprocal keeps the
    # 1e-5 tolerance vs jax.nn.sigmoid (pass approx=True if ~1e-3 is OK).
    sig = pl.reciprocal(1.0 + jnp.exp(-xf))
    o_ref[...] = (xf * sig).astype(o_ref.dtype)


def swish(x, *, block_bytes=2 * 1024 * 1024, donate=False):
    """Elementwise Swish over an arbitrary-shaped array (NCHW supported)."""
    orig_shape = x.shape
    orig_dtype = x.dtype
    n = x.size
    itemsize = jnp.dtype(orig_dtype).itemsize

    vreg_elems = _SUBLANE * _LANE  # 1024
    if n % vreg_elems == 0:
        # Fast path: contiguous reshape only — no extra HBM copies.
        rows = n // _LANE
        x_flat = x.reshape(rows, _LANE)
        pad = 0
    else:
        # Ragged tail: pad up to a whole (8, 128) vreg tile.
        rows = pl.cdiv(n, _LANE)
        rows = pl.cdiv(rows, _SUBLANE) * _SUBLANE
        pad = rows * _LANE - n
        x_flat = jnp.pad(x.reshape(-1), (0, pad)).reshape(rows, _LANE)

    # ~block_bytes per block (2 MiB -> 4096 rows @ f32, 8192 @ bf16); with
    # double-buffered input + output that is ~4x block_bytes of VMEM, which
    # fits every generation's default scoped-VMEM limit (incl. v5e's 16 MiB).
    tr = max(_SUBLANE,
             (block_bytes // (_LANE * itemsize)) // _SUBLANE * _SUBLANE)
    tr = min(tr, rows)
    grid = pl.cdiv(rows, tr)  # last block may be partial; Pallas masks it.

    out_flat = pl.pallas_call(
        _swish_kernel,
        out_shape=jax.ShapeDtypeStruct((rows, _LANE), orig_dtype),
        grid_spec=pltpu.PrefetchScalarGridSpec(
            num_scalar_prefetch=0,
            grid=(grid,),
            in_specs=[pl.BlockSpec((tr, _LANE), lambda i: (i, 0))],
            out_specs=pl.BlockSpec((tr, _LANE), lambda i: (i, 0)),
        ),
        compiler_params=pltpu.CompilerParams(
            # "parallel" lets v7x split the row grid across its 2 TensorCores;
            # it's a no-op on single-TC v5e/v6e.
            dimension_semantics=("parallel",)),
        # Optional buffer donation (halves HBM footprint; only enable when the
        # caller no longer needs x).
        input_output_aliases=({0: 0} if donate else {}),
    )(x_flat)

    if pad:
        return out_flat.reshape(-1)[:n].reshape(orig_shape)
    return out_flat.reshape(orig_shape)


if __name__ == "__main__":
    key = jax.random.PRNGKey(0)
    x = jax.random.normal(key, (2, 4, 16, 16), dtype=jnp.float32)  # NCHW

    y = jax.block_until_ready(swish(x))
    y_ref = x * jax.nn.sigmoid(x)
    assert y.shape == x.shape and y.dtype == x.dtype
    assert jnp.allclose(y, y_ref, atol=1e-5, rtol=1e-5)

    # Ragged element count -> exercises the padded path.
    x2 = jax.random.normal(jax.random.PRNGKey(1), (3, 5, 7, 9), dtype=jnp.float32)
    y2 = jax.block_until_ready(swish(x2))
    assert jnp.allclose(y2, x2 * jax.nn.sigmoid(x2), atol=1e-5, rtol=1e-5)

    # rows=24, tr=16 -> grid of 2 with a masked partial last block.
    x3 = jax.random.normal(jax.random.PRNGKey(2), (24, 128), dtype=jnp.float32)
    y3 = jax.block_until_ready(swish(x3, block_bytes=16 * _LANE * 4))
    assert jnp.allclose(y3, x3 * jax.nn.sigmoid(x3), atol=1e-5, rtol=1e-5)

    print("KERNEL_OK")
</pallas_src>

<mosaic_0001>
module attributes {stable_mosaic.version = 11 : i64} {
  func.func @_swish_kernel(%arg0: i32, %arg1: memref<16x128xf32, #tpu.memory_space<vmem>>, %arg2: memref<16x128xf32, #tpu.memory_space<vmem>>) attributes {dimension_semantics = [#tpu.dimension_semantics<parallel>], iteration_bounds = array<i64: 1>, scalar_prefetch = 0 : i64, scratch_operands = 0 : i64, tpu.core_type = #tpu.core_type<tc>, window_params = [{transform_indices = @transform_0, window_bounds = array<i64: 16, 128>}, {transform_indices = @transform_1, window_bounds = array<i64: 16, 128>}]} {
    %c0 = arith.constant 0 : index
    %c0_0 = arith.constant 0 : index
    %0 = vector.load %arg1[%c0, %c0_0] : memref<16x128xf32, #tpu.memory_space<vmem>>, vector<16x128xf32>
    %cst = arith.constant 0.000000e+00 : f32
    %1 = vector.broadcast %cst : f32 to vector<16x128xf32>
    %2 = arith.subf %1, %0 : vector<16x128xf32>
    %3 = math.exp %2 : vector<16x128xf32>
    %cst_1 = arith.constant 1.000000e+00 : f32
    %4 = vector.broadcast %cst_1 : f32 to vector<16x128xf32>
    %5 = arith.addf %4, %3 : vector<16x128xf32>
    %6 = tpu.reciprocal %5 : vector<16x128xf32> -> vector<16x128xf32>
    %7 = arith.mulf %0, %6 : vector<16x128xf32>
    %c0_2 = arith.constant 0 : index
    %c0_3 = arith.constant 0 : index
    %8 = vector.load %arg2[%c0_2, %c0_3] : memref<16x128xf32, #tpu.memory_space<vmem>>, vector<16x128xf32>
    tpu.vector_store %arg2[%c0_2, %c0_3], %7 {strides = array<i32>} : memref<16x128xf32, #tpu.memory_space<vmem>>, vector<16x128xf32>,
    return
  }
  func.func @transform_0(%arg0: i32) -> (i32, i32) {
    %c0_i32 = arith.constant 0 : i32
    %c0_i32_0 = arith.constant 0 : i32
    return %arg0, %c0_i32 : i32, i32
  }
  func.func @transform_1(%arg0: i32) -> (i32, i32) {
    %c0_i32 = arith.constant 0 : i32
    %c0_i32_0 = arith.constant 0 : i32
    return %arg0, %c0_i32 : i32, i32
  }
}

</mosaic_0001>

<bundles_post_ra>
// kernel: tpu_custom_call.1
= control target key start
LH: loop header
LB: loop body
LE: loop exit
PB: predicated region body
PF: predicated region fallthrough
CT: control target
= control target key end

     0   :  { %6 = vsyncpa [#allocation3], 0  ;;  %s176_s0 = inlined_call_operand.hbm [shape: f32[16,128], index: 0, kind: input, shape index: {}]   ;;  %s177_s1 = inlined_call_operand.hbm [shape: f32[16,128], index: 1, kind: output, shape index: {}]  }
   0x1   :  { %7 = vsyncpa [#allocation4], 0  ;;  %s12_s8 = sshll.u32 %s176_s0, 4  ;;  %s150_s9 = smov [#allocation2]   ;;  %s13_s8 = int_to_ptr.hbm [resolvable:$true] %s12_s8 }
   0x2   :  { %s14_s10 = sshll.u32 %s150_s9, 4  ;;  %s151_s11 = smov 128   ;;  %s15_s10 = int_to_ptr.vmem [resolvable:$true] %s14_s10 }
   0x3   :  { %s152_s12 = smov 8  }
   0x4   :  { %20 = dma.hbm_to_vmem [thread:$0]  %s13_s8, 256, %s15_s10, [#allocation3], %s151_s11, %s151_s11, %s152_s12  }
   0x5   :  { %146 = dma.done.wait [#allocation3], 256  }
   0x6   :  { %147 = vsyncadd [#allocation3], 4294967040  ;;  %v25_v0 = vld [vmem:[#allocation2] sm:$0xff]  ;;  %v26_v1 = vld [vmem:[#allocation2 + $0x8] sm:$0xff]  ;;  %s153_s0 = smov [#allocation5]   ;;  %s73_s16 = sshll.u32 %s177_s1, 4  ;;  %s74_s16 = int_to_ptr.hbm [resolvable:$true] %s73_s16 }
   0x7   :  { %v27_v2 = vsub.f32 0.0, %v25_v0  ;;  %v28_v3 = vsub.f32 0.0, %v26_v1  ;;  %s71_s13 = sshll.u32 %s153_s0, 4  ;;  %s72_s13 = int_to_ptr.vmem [resolvable:$true] %s71_s13 }
   0x9   :  { %v29_v4 = vmul.f32 1.442695, %v27_v2  ;;  %v31_v5 = vmul.f32 1.442695, %v28_v3 }
   0xb   :  { %90 = vpow2.f32 %v29_v4 }
   0xc   :  { %92 = vpow2.f32 %v31_v5 }
  0x11   :  { %v91_v6 = vpop.eup %90 }
  0x12   :  { %v93_v7 = vpop.eup %92  ;;  %v33_v8 = vadd.f32 1.0, %v91_v6 }
  0x13   :  { %v34_v9 = vadd.f32 1.0, %v93_v7 }
  0x14   :  { %94 = vrcp.f32 %v33_v8  ;;  %vm40_vm0 = vweird.f32 %v33_v8  ;;  %v46_v13 = vand.u32 2147483648, %v33_v8  ;;  %v44_v16 = vand.u32 2147483647, %v33_v8 }
  0x15   :  { %96 = vrcp.f32 %v34_v9  ;;  %v60_v17 = vand.u32 2147483648, %v34_v9  ;;  %vm54_vm2 = vweird.f32 %v34_v9  ;;  %v58_v19 = vand.u32 2147483647, %v34_v9 }
  0x16   :  { %v47_v21 = vor.u32 1.1754944e-38, %v46_v13  ;;  %vm45_vm5 = vcmp.eq.f32.partialorder %v44_v16, 8.507059e+37 }
  0x17   :  { %v61_v24 = vor.u32 1.1754944e-38, %v60_v17  ;;  %vm59_vm7 = vcmp.eq.f32.partialorder %v58_v19, 8.507059e+37 }
  0x1a   :  { %v95_v10 = vpop.eup %94 }
  0x1b   :  { %v97_v11 = vpop.eup %96  ;;  %v36_v12 = vmul.f32 %v95_v10, %v33_v8  ;;  %vm41_vm1 = vweird.f32 %v95_v10 }
  0x1c   :  { %v50_v14 = vmul.f32 %v97_v11, %v34_v9  ;;  %vm55_vm3 = vweird.f32 %v97_v11  ;;  %vm42_vm4 = vmor %vm40_vm0, %vm41_vm1 }
  0x1d   :  { %v37_v15 = vsub.f32 1.0, %v36_v12  ;;  %vm56_vm6 = vmor %vm54_vm2, %vm55_vm3 }
  0x1e   :  { %v51_v18 = vsub.f32 1.0, %v50_v14 }
  0x1f   :  { %v38_v20 = vmul.f32 %v95_v10, %v37_v15 }
  0x20   :  { %v52_v22 = vmul.f32 %v97_v11, %v51_v18 }
  0x21   :  { %v39_v23 = vadd.f32 %v95_v10, %v38_v20 }
  0x22   :  { %v53_v25 = vadd.f32 %v97_v11, %v52_v22 }
  0x23   :  { %v43_v26 = vsel %vm42_vm4, %v95_v10, %v39_v23 }
  0x24   :  { %v48_v27 = vsel %vm45_vm5, %v47_v21, %v43_v26  ;;  %v57_v28 = vsel %vm56_vm6, %v97_v11, %v53_v25 }
  0x25   :  { %v63_v29 = vmul.f32 %v48_v27, %v25_v0  ;;  %v62_v30 = vsel %vm59_vm7, %v61_v24, %v57_v28 }
  0x26   :  { %v64_v31 = vmul.f32 %v62_v30, %v26_v1 }
  0x27   :  { %65 = vst [vmem:[#allocation5] sm:$0xff] %v63_v29 }
  0x28   :  { %66 = vst [vmem:[#allocation5 + $0x8] sm:$0xff] %v64_v31 }
  0x29   :  { %79 = dma.vmem_to_hbm [thread:$0]  %s72_s13, 256, %s74_s16, [#allocation4], %s151_s11, %s151_s11, %s152_s12  }
  0x2a   :  { %148 = dma.done.wait [#allocation4], 256  }
  0x2b   :  { %149 = vsyncadd [#allocation4], 4294967040 }
  0x2c   :  { %84 = vsyncpa [#allocation3], 1 }
  0x2d   :  { %85 = vsyncpa [#allocation4], 1 }

</bundles_post_ra>
